<compile_context>
chip_gen: v6e
topology: v6e:2x2x1
jax: 0.10.0
libtpu: 0.0.40
codegen_flags: <defaults>
</compile_context>

<pallas_src>
import functools

import jax
import jax.numpy as jnp
from jax.experimental import pallas as pl
from jax.experimental.pallas import tpu as pltpu

_MIB = 1024 * 1024


# --------------------------------------------------------------------------
# Sizing helpers
# --------------------------------------------------------------------------
def _round_up(v, m):
    return -(-v // m) * m


def _tile_bytes(rows, cols, itemsize):
    """VMEM footprint of a 2-D (rows, cols) slab after (sublane, lane) padding."""
    sub = max(8, 32 // itemsize)
    return _round_up(max(rows, 1), sub) * _round_up(max(cols, 1), 128) * itemsize


def _vmem_budget_bytes():
    """Generation-aware budget for pipelined data blocks (leaves headroom for
    Mosaic internal scratch and the resident weight buffers)."""
    cap = 64 * _MIB
    try:
        cap = int(pltpu.get_tpu_info().vmem_capacity_bytes)
    except Exception:
        pass
    if cap >= 100 * _MIB:          # v5e / v6e: 128 MiB physical VMEM
        return 96 * _MIB, cap
    return 40 * _MIB, cap          # v7x: 64 MiB per TensorCore


def _vmem_limit(needed, budget):
    return int(max(32 * _MIB, min(budget + 16 * _MIB, needed + 8 * _MIB)))


def _divisors_desc(n):
    return [d for d in range(n, 0, -1) if n % d == 0]


def _choose_bt(batch, block_bytes_fn, resident_bytes_fn, valid_fn, budget):
    """Largest batch tile (divisor of `batch`) whose pipeline fits `budget`,
    preferring >=4 (and even) grid steps so megacore / DMA overlap exists."""
    fits = []
    for d in _divisors_desc(batch):
        if not valid_fn(d):
            continue
        needed = 4 * block_bytes_fn(d) + resident_bytes_fn(d) + 2 * _MIB
        if needed <= budget:
            fits.append(d)
    if not fits:
        return None
    cap = max(1, batch // 4)                     # keep the grid >= 4 steps if possible
    capped = [d for d in fits if d <= cap]
    if capped:
        even = [d for d in capped if (batch // d) % 2 == 0]
        return (even or capped)[0]               # largest such divisor
    return fits[-1]                              # smallest valid divisor that fits


# --------------------------------------------------------------------------
# Kernels
# --------------------------------------------------------------------------
def _se_kernel_3d(x_ref, w1t_ref, b1_ref, w2t_ref, b2_ref, o_ref):
    # x_ref: (Bt, C, HW).  w1t is pre-scaled by 1/HW, so the spatial sum == mean.
    s = jnp.sum(x_ref[...], axis=2, dtype=jnp.float32)                    # (Bt, C)
    h = jnp.dot(s, w1t_ref[...], preferred_element_type=jnp.float32) + b1_ref[...]
    h = jnp.maximum(h, 0.0)                                               # (Bt, Cr)
    e = jnp.dot(h, w2t_ref[...], preferred_element_type=jnp.float32) + b2_ref[...]
    e = jax.nn.sigmoid(e)                                                 # (Bt, C)
    # Re-read x from VMEM for the scale (no full-tile value held live).
    o_ref[...] = (x_ref[...] * e.astype(x_ref.dtype)[:, :, None]).astype(o_ref.dtype)


def _se_kernel_packed(x_ref, sel_ref, w1e_ref, b1_ref, selt_ref, w2e_ref, b2e_ref, o_ref):
    # x_ref: (Bt*C, HW); row i <-> (batch i // C, channel i % C).
    # The (Bt*C,) <-> (Bt, C) regrouping is folded into the excitation matmuls
    # through tiny 0/1 selection matrices, so no in-kernel reshapes are needed.
    s = jnp.sum(x_ref[...], axis=1, keepdims=True, dtype=jnp.float32)     # (Bt*C, 1)
    # fc1: h[b, r] = sum_i sel[b, i] * s[i] * w1t[i % C, r] / HW
    h = jnp.dot(sel_ref[...], s * w1e_ref[...],
                preferred_element_type=jnp.float32) + b1_ref[...]         # (Bt, Cr)
    h = jnp.maximum(h, 0.0)
    # fc2: z[i] = sum_r h[i // C, r] * w2[i % C, r] + b2[i % C]
    hb = jnp.dot(selt_ref[...], h, preferred_element_type=jnp.float32)    # (Bt*C, Cr)
    z = jnp.sum(hb * w2e_ref[...], axis=1, keepdims=True) + b2e_ref[...]  # (Bt*C, 1)
    e = jax.nn.sigmoid(z)
    o_ref[...] = (x_ref[...] * e.astype(x_ref.dtype)).astype(o_ref.dtype)


def _pool_kernel(x_ref, s_ref, *, hw, thw):
    # Spatial-tiled global sum; masks the ragged tail of the last tile.
    t = pl.program_id(1)
    lane = jax.lax.broadcasted_iota(jnp.int32, x_ref.shape, 2)
    valid = (lane + t * thw) < hw
    part = jnp.sum(jnp.where(valid, x_ref[...], 0), axis=2, keepdims=True,
                   dtype=jnp.float32)                                     # (1, C, 1)

    @pl.when(t == 0)
    def _():
        s_ref[...] = jnp.zeros_like(s_ref)

    s_ref[...] += part


def _scale_kernel(e_ref, x_ref, o_ref):
    o_ref[...] = (x_ref[...] * e_ref[...].astype(x_ref.dtype)).astype(o_ref.dtype)


# --------------------------------------------------------------------------
# Wrapper
# --------------------------------------------------------------------------
def se_block(x, w1, b1, w2, b2):
    """SEBlock forward.  x: (B, C, H, W); w1: (Cr, C); b1: (Cr,); w2: (C, Cr); b2: (C,)."""
    B, C, H, W = x.shape
    Cr = w1.shape[0]
    HW = H * W
    itemsize = jnp.dtype(x.dtype).itemsize
    sub = max(8, 32 // itemsize)                 # sublane packing of x's dtype
    budget, _ = _vmem_budget_bytes()
    f32 = jnp.float32

    x3 = x.reshape(B, C, HW)                     # pure metadata reshape, no HBM copy
    # Excitation parameters in f32; the 1/HW of the mean is folded into fc1.
    w1t = jnp.transpose(w1).astype(f32) * (1.0 / HW)        # (C, Cr)
    w2t = jnp.transpose(w2).astype(f32)                     # (Cr, C)
    b1r = b1.reshape(1, Cr).astype(f32)
    b2r = b2.reshape(1, C).astype(f32)

    # ---- Path 1: packed 2-D layout for small / ragged channel counts ----------
    if C % sub != 0:
        def blk_bytes(d):
            return _tile_bytes(d * C, HW, itemsize)

        def res_bytes(d):
            return 2 * (_tile_bytes(d, d * C, 4) + _tile_bytes(d * C, d, 4)
                        + 2 * _tile_bytes(d * C, Cr, 4) + _tile_bytes(1, Cr, 4)
                        + _tile_bytes(d * C, 1, 4))

        def valid(d):
            # block sublane dim must be a multiple of the packing or the full dim,
            # and the selection matrices must stay tiny.
            return d * C <= 4096 and (((d * C) % sub == 0) or d == B)

        bt = _choose_bt(B, blk_bytes, res_bytes, valid, budget)
        if bt is not None:
            n = bt * C
            sel = jnp.kron(jnp.eye(bt, dtype=f32), jnp.ones((1, C), f32))   # (bt, n)
            selt = jnp.kron(jnp.eye(bt, dtype=f32), jnp.ones((C, 1), f32))  # (n, bt)
            w1e = jnp.tile(w1t, (bt, 1))                                    # (n, Cr)
            w2e = jnp.tile(w2.astype(f32), (bt, 1))                         # (n, Cr)
            b2e = jnp.tile(b2.astype(f32).reshape(C, 1), (bt, 1))           # (n, 1)
            needed = 4 * blk_bytes(bt) + res_bytes(bt) + 2 * _MIB
            out2 = pl.pallas_call(
                _se_kernel_packed,
                out_shape=jax.ShapeDtypeStruct((B * C, HW), x.dtype),
                grid_spec=pltpu.PrefetchScalarGridSpec(
                    num_scalar_prefetch=0,
                    grid=(B // bt,),
                    in_specs=[
                        pl.BlockSpec((n, HW), lambda i: (i, 0)),
                        pl.BlockSpec((bt, n), lambda i: (0, 0)),
                        pl.BlockSpec((n, Cr), lambda i: (0, 0)),
                        pl.BlockSpec((1, Cr), lambda i: (0, 0)),
                        pl.BlockSpec((n, bt), lambda i: (0, 0)),
                        pl.BlockSpec((n, Cr), lambda i: (0, 0)),
                        pl.BlockSpec((n, 1), lambda i: (0, 0)),
                    ],
                    out_specs=pl.BlockSpec((n, HW), lambda i: (i, 0)),
                ),
                compiler_params=pltpu.CompilerParams(
                    dimension_semantics=("parallel",),
                    vmem_limit_bytes=_vmem_limit(needed, budget)),
            )(x3.reshape(B * C, HW), sel, w1e, b1r, selt, w2e, b2e)
            return out2.reshape(B, C, H, W)

    # ---- Path 2: 3-D layout (Bt, C, HW); C a multiple of the sublane packing --
    res3d = 2 * (_tile_bytes(C, Cr, 4) + _tile_bytes(Cr, C, 4)
                 + _tile_bytes(1, Cr, 4) + _tile_bytes(1, C, 4))
    blk3d = lambda d: d * _tile_bytes(C, HW, itemsize)
    bt = _choose_bt(B, blk3d, lambda d: res3d, lambda d: True, budget)
    if bt is not None:
        needed = 4 * blk3d(bt) + res3d + 2 * _MIB
        out3 = pl.pallas_call(
            _se_kernel_3d,
            out_shape=jax.ShapeDtypeStruct((B, C, HW), x.dtype),
            grid_spec=pltpu.PrefetchScalarGridSpec(
                num_scalar_prefetch=0,
                grid=(B // bt,),
                in_specs=[
                    pl.BlockSpec((bt, C, HW), lambda i: (i, 0, 0)),
                    pl.BlockSpec((C, Cr), lambda i: (0, 0)),
                    pl.BlockSpec((1, Cr), lambda i: (0, 0)),
                    pl.BlockSpec((Cr, C), lambda i: (0, 0)),
                    pl.BlockSpec((1, C), lambda i: (0, 0)),
                ],
                out_specs=pl.BlockSpec((bt, C, HW), lambda i: (i, 0, 0)),
            ),
            compiler_params=pltpu.CompilerParams(
                dimension_semantics=("parallel",),
                vmem_limit_bytes=_vmem_limit(needed, budget)),
        )(x3, w1t, b1r, w2t, b2r)
        return out3.reshape(B, C, H, W)

    # ---- Path 3: two-phase fallback for huge C*HW (spatial-tiled pool + scale) -
    # Reads x twice from HBM but keeps every block inside the VMEM budget.
    c_pad = _round_up(C, sub)
    max_lanes = max(128, (budget - 4 * _MIB) // (4 * c_pad * itemsize))
    thw = min(_round_up(HW, 128), (max_lanes // 128) * 128)
    if thw >= HW:
        thw = HW                                   # full dim -> no 128 constraint
    n_t = -(-HW // thw)
    needed2 = 4 * _tile_bytes(C, thw, itemsize) + 2 * _MIB
    limit2 = _vmem_limit(needed2, budget)
    # TODO(synk): if C alone is so large that even a 128-lane block overflows
    # VMEM, a channel-tiled variant would be needed as well.

    sums = pl.pallas_call(
        functools.partial(_pool_kernel, hw=HW, thw=thw),
        out_shape=jax.ShapeDtypeStruct((B, C, 1), f32),
        grid_spec=pltpu.PrefetchScalarGridSpec(
            num_scalar_prefetch=0,
            grid=(B, n_t),
            in_specs=[pl.BlockSpec((1, C, thw), lambda b, t: (b, 0, t))],
            out_specs=pl.BlockSpec((1, C, 1), lambda b, t: (b, 0, 0)),
        ),
        compiler_params=pltpu.CompilerParams(
            dimension_semantics=("parallel", "arbitrary"),
            vmem_limit_bytes=limit2),
    )(x3)

    avg = sums[:, :, 0] * (1.0 / HW)                                  # (B, C) f32
    h = jnp.maximum(avg @ jnp.transpose(w1).astype(f32) + b1.astype(f32), 0.0)
    e = jax.nn.sigmoid(h @ jnp.transpose(w2).astype(f32) + b2.astype(f32))
    e3 = e[:, :, None]                                                # (B, C, 1)

    out3 = pl.pallas_call(
        _scale_kernel,
        out_shape=jax.ShapeDtypeStruct((B, C, HW), x.dtype),
        grid_spec=pltpu.PrefetchScalarGridSpec(
            num_scalar_prefetch=0,
            grid=(B, n_t),
            in_specs=[pl.BlockSpec((1, C, 1), lambda b, t: (b, 0, 0)),
                      pl.BlockSpec((1, C, thw), lambda b, t: (b, 0, t))],
            out_specs=pl.BlockSpec((1, C, thw), lambda b, t: (b, 0, t)),
        ),
        compiler_params=pltpu.CompilerParams(
            dimension_semantics=("parallel", "parallel"),
            vmem_limit_bytes=limit2),
    )(e3, x3)
    return out3.reshape(B, C, H, W)


def se_block_ref(x, w1, b1, w2, b2):
    """Pure-JAX reference matching the PyTorch forward."""
    avg = jnp.mean(x, axis=(2, 3))                       # (B, C)
    h = jnp.maximum(avg @ w1.T + b1, 0.0)                # (B, Cr)
    e = jax.nn.sigmoid(h @ w2.T + b2)                    # (B, C)
    return x * e[:, :, None, None]


if __name__ == "__main__":
    # Shapes implied by the module: NCHW input.
    B, C, H, W = 2, 4, 16, 16
    reduction = 16
    if C // reduction == 0:
        reduction = max(1, C // 2)      # matches the PyTorch module -> reduction = 2
    Cr = C // reduction                 # -> 2

    key = jax.random.PRNGKey(0)
    kx, kw1, kb1, kw2, kb2 = jax.random.split(key, 5)

    x = jax.random.normal(kx, (B, C, H, W), dtype=jnp.float32)
    # Conv2d 1x1 == linear: weight (out, in).
    w1 = jax.random.normal(kw1, (Cr, C), dtype=jnp.float32) * 0.5
    b1 = jax.random.normal(kb1, (Cr,), dtype=jnp.float32) * 0.1
    w2 = jax.random.normal(kw2, (C, Cr), dtype=jnp.float32) * 0.5
    b2 = jax.random.normal(kb2, (C,), dtype=jnp.float32) * 0.1

    out = jax.block_until_ready(jax.jit(se_block)(x, w1, b1, w2, b2))
    ref = se_block_ref(x, w1, b1, w2, b2)

    assert out.shape == (B, C, H, W)
    assert jnp.allclose(out, ref, atol=1e-5, rtol=1e-5), "mismatch vs reference"
    print("KERNEL_OK")
</pallas_src>

<mosaic_0001>
module attributes {stable_mosaic.version = 11 : i64} {
  func.func @_se_kernel_packed(%arg0: i32, %arg1: memref<8x256xf32, #tpu.memory_space<vmem>>, %arg2: memref<2x8xf32, #tpu.memory_space<vmem>>, %arg3: memref<8x2xf32, #tpu.memory_space<vmem>>, %arg4: memref<1x2xf32, #tpu.memory_space<vmem>>, %arg5: memref<8x2xf32, #tpu.memory_space<vmem>>, %arg6: memref<8x2xf32, #tpu.memory_space<vmem>>, %arg7: memref<8x1xf32, #tpu.memory_space<vmem>>, %arg8: memref<8x256xf32, #tpu.memory_space<vmem>>) attributes {dimension_semantics = [#tpu.dimension_semantics<parallel>], iteration_bounds = array<i64: 1>, scalar_prefetch = 0 : i64, scratch_operands = 0 : i64, tpu.core_type = #tpu.core_type<tc>, window_params = [{transform_indices = @transform_0, window_bounds = array<i64: 8, 256>}, {pipeline_mode = #tpu.pipeline_mode<synchronous>, transform_indices = @transform_1, window_bounds = array<i64: 2, 8>}, {pipeline_mode = #tpu.pipeline_mode<synchronous>, transform_indices = @transform_2, window_bounds = array<i64: 8, 2>}, {pipeline_mode = #tpu.pipeline_mode<synchronous>, transform_indices = @transform_3, window_bounds = array<i64: 1, 2>}, {pipeline_mode = #tpu.pipeline_mode<synchronous>, transform_indices = @transform_4, window_bounds = array<i64: 8, 2>}, {pipeline_mode = #tpu.pipeline_mode<synchronous>, transform_indices = @transform_5, window_bounds = array<i64: 8, 2>}, {pipeline_mode = #tpu.pipeline_mode<synchronous>, transform_indices = @transform_6, window_bounds = array<i64: 8, 1>}, {transform_indices = @transform_7, window_bounds = array<i64: 8, 256>}]} {
    %c0 = arith.constant 0 : index
    %c0_0 = arith.constant 0 : index
    %0 = vector.load %arg1[%c0, %c0_0] : memref<8x256xf32, #tpu.memory_space<vmem>>, vector<8x256xf32>
    %cst = arith.constant dense<0.000000e+00> : vector<8xf32>
    %1 = vector.multi_reduction <add>, %0, %cst [1] : vector<8x256xf32> to vector<8xf32>
    %2 = vector.shape_cast %1 : vector<8xf32> to vector<8x1xf32>
    %c0_1 = arith.constant 0 : index
    %c0_2 = arith.constant 0 : index
    %3 = vector.load %arg2[%c0_1, %c0_2] : memref<2x8xf32, #tpu.memory_space<vmem>>, vector<2x8xf32>
    %c0_3 = arith.constant 0 : index
    %c0_4 = arith.constant 0 : index
    %4 = vector.load %arg3[%c0_3, %c0_4] : memref<8x2xf32, #tpu.memory_space<vmem>>, vector<8x2xf32>
    %5 = vector.broadcast %2 : vector<8x1xf32> to vector<8x2xf32>
    %6 = arith.mulf %5, %4 : vector<8x2xf32>
    %cst_5 = arith.constant dense<0.000000e+00> : vector<2x2xf32>
    %7 = tpu.matmul %3, %6, %cst_5 {dimension_numbers = #tpu.dot_dimension_numbers<[1], [0], [0], [1], [0, 0, 1, 1], [], []>} : vector<2x8xf32>, vector<8x2xf32>, vector<2x2xf32> -> vector<2x2xf32>
    %c0_6 = arith.constant 0 : index
    %c0_7 = arith.constant 0 : index
    %8 = vector.load %arg4[%c0_6, %c0_7] : memref<1x2xf32, #tpu.memory_space<vmem>>, vector<1x2xf32>
    %9 = vector.broadcast %8 : vector<1x2xf32> to vector<2x2xf32>
    %10 = arith.addf %7, %9 : vector<2x2xf32>
    %cst_8 = arith.constant 0.000000e+00 : f32
    %11 = vector.broadcast %cst_8 : f32 to vector<2x2xf32>
    %12 = arith.maximumf %10, %11 : vector<2x2xf32>
    %c0_9 = arith.constant 0 : index
    %c0_10 = arith.constant 0 : index
    %13 = vector.load %arg5[%c0_9, %c0_10] : memref<8x2xf32, #tpu.memory_space<vmem>>, vector<8x2xf32>
    %cst_11 = arith.constant dense<0.000000e+00> : vector<8x2xf32>
    %14 = tpu.matmul %13, %12, %cst_11 {dimension_numbers = #tpu.dot_dimension_numbers<[1], [0], [0], [1], [0, 0, 1, 1], [], []>} : vector<8x2xf32>, vector<2x2xf32>, vector<8x2xf32> -> vector<8x2xf32>
    %c0_12 = arith.constant 0 : index
    %c0_13 = arith.constant 0 : index
    %15 = vector.load %arg6[%c0_12, %c0_13] : memref<8x2xf32, #tpu.memory_space<vmem>>, vector<8x2xf32>
    %16 = arith.mulf %14, %15 : vector<8x2xf32>
    %cst_14 = arith.constant dense<0.000000e+00> : vector<8xf32>
    %17 = vector.multi_reduction <add>, %16, %cst_14 [1] : vector<8x2xf32> to vector<8xf32>
    %18 = vector.shape_cast %17 : vector<8xf32> to vector<8x1xf32>
    %c0_15 = arith.constant 0 : index
    %c0_16 = arith.constant 0 : index
    %19 = vector.load %arg7[%c0_15, %c0_16] : memref<8x1xf32, #tpu.memory_space<vmem>>, vector<8x1xf32>
    %20 = arith.addf %18, %19 : vector<8x1xf32>
    %21 = arith.negf %20 : vector<8x1xf32>
    %22 = math.exp %21 : vector<8x1xf32>
    %cst_17 = arith.constant 1.000000e+00 : f32
    %23 = vector.broadcast %cst_17 : f32 to vector<8x1xf32>
    %24 = arith.addf %23, %22 : vector<8x1xf32>
    %25 = arith.divf %23, %24 : vector<8x1xf32>
    %c0_18 = arith.constant 0 : index
    %c0_19 = arith.constant 0 : index
    %26 = vector.load %arg1[%c0_18, %c0_19] : memref<8x256xf32, #tpu.memory_space<vmem>>, vector<8x256xf32>
    %27 = vector.broadcast %25 : vector<8x1xf32> to vector<8x256xf32>
    %28 = arith.mulf %26, %27 : vector<8x256xf32>
    %c0_20 = arith.constant 0 : index
    %c0_21 = arith.constant 0 : index
    %29 = vector.load %arg8[%c0_20, %c0_21] : memref<8x256xf32, #tpu.memory_space<vmem>>, vector<8x256xf32>
    tpu.vector_store %arg8[%c0_20, %c0_21], %28 {strides = array<i32>} : memref<8x256xf32, #tpu.memory_space<vmem>>, vector<8x256xf32>,
    return
  }
  func.func @transform_0(%arg0: i32) -> (i32, i32) {
    %c0_i32 = arith.constant 0 : i32
    %c0_i32_0 = arith.constant 0 : i32
    return %arg0, %c0_i32 : i32, i32
  }
  func.func @transform_1(%arg0: i32) -> (i32, i32) {
    %c0_i32 = arith.constant 0 : i32
    %c0_i32_0 = arith.constant 0 : i32
    %c0_i32_1 = arith.constant 0 : i32
    return %c0_i32, %c0_i32_0 : i32, i32
  }
  func.func @transform_2(%arg0: i32) -> (i32, i32) {
    %c0_i32 = arith.constant 0 : i32
    %c0_i32_0 = arith.constant 0 : i32
    %c0_i32_1 = arith.constant 0 : i32
    return %c0_i32, %c0_i32_0 : i32, i32
  }
  func.func @transform_3(%arg0: i32) -> (i32, i32) {
    %c0_i32 = arith.constant 0 : i32
    %c0_i32_0 = arith.constant 0 : i32
    %c0_i32_1 = arith.constant 0 : i32
    return %c0_i32, %c0_i32_0 : i32, i32
  }
  func.func @transform_4(%arg0: i32) -> (i32, i32) {
    %c0_i32 = arith.constant 0 : i32
    %c0_i32_0 = arith.constant 0 : i32
    %c0_i32_1 = arith.constant 0 : i32
    return %c0_i32, %c0_i32_0 : i32, i32
  }
  func.func @transform_5(%arg0: i32) -> (i32, i32) {
    %c0_i32 = arith.constant 0 : i32
    %c0_i32_0 = arith.constant 0 : i32
    %c0_i32_1 = arith.constant 0 : i32
    return %c0_i32, %c0_i32_0 : i32, i32
  }
  func.func @transform_6(%arg0: i32) -> (i32, i32) {
    %c0_i32 = arith.constant 0 : i32
    %c0_i32_0 = arith.constant 0 : i32
    %c0_i32_1 = arith.constant 0 : i32
    return %c0_i32, %c0_i32_0 : i32, i32
  }
  func.func @transform_7(%arg0: i32) -> (i32, i32) {
    %c0_i32 = arith.constant 0 : i32
    %c0_i32_0 = arith.constant 0 : i32
    return %arg0, %c0_i32 : i32, i32
  }
}

</mosaic_0001>

<bundles_post_ra>
// kernel: se_block.1
= control target key start
LH: loop header
LB: loop body
LE: loop exit
PB: predicated region body
PF: predicated region fallthrough
CT: control target
= control target key end

     0   :  { %v249_v3 = vmov 0.0   ;;  %vm250_vm0 = vmmov 0   ;;  %vm41_vm1 = vcmask 64512   ;;  %vm121_vm2 = vcmask 1041408   ;;  %s322_s0 = inlined_call_operand.vmem [shape: f32[8,256], index: 0, kind: input, shape index: {}]   ;;  %s323_s2 = inlined_call_operand.vmem [shape: f32[8,2], index: 2, kind: input, shape index: {}]   ;;  %s324_s1 = inlined_call_operand.vmem [shape: f32[2,8], index: 1, kind: input, shape index: {}]   ;;  %s325_s3 = inlined_call_operand.vmem [shape: f32[1,2], index: 3, kind: input, shape index: {}]   ;;  %s326_s4 = inlined_call_operand.vmem [shape: f32[8,2], index: 4, kind: input, shape index: {}]   ;;  %s327_s5 = inlined_call_operand.vmem [shape: f32[8,2], index: 5, kind: input, shape index: {}]   ;;  %s328_s6 = inlined_call_operand.vmem [shape: f32[8,1], index: 6, kind: input, shape index: {}]   ;;  %s329_s7 = inlined_call_operand.vmem [shape: f32[8,256], index: 7, kind: output, shape index: {}]  }
   0x1   :  { %v26_v0 = vld [vmem:[%s322_s0] sm:$0xff]  ;;  %v27_v1 = vld [vmem:[%s322_s0 + $0x8] sm:$0xff]  ;;  %230 = vmatprep.subr.mxu0 %v249_v3  ;;  %235 = vmatprep.subr.mxu1 %v249_v3  ;;  %vm117_vm3 = vcmask 15360   ;;  %v251_v19 = vmov 0  }
   0x2   :  { %v28_v2 = vadd.f32 %v27_v1, %v26_v0  ;;  %232 = vmatprep.mubr.msk.f32.mxu0 %vm250_vm0, %v249_v3  ;;  %237 = vmatprep.mubr.msk.f32.mxu1 %vm250_vm0, %v249_v3  ;;  %v32_v4 = vld [vmem:[%s323_s2] sm:$0xff] }
   0x3   :  { %v31_v7 = vld [vmem:[%s324_s1] sm:$0x3]  ;;  %243 = vset.pattern.permute.xlu1 %v251_v19  ;;  %244 = vset.pattern.permute.xlu0 %v251_v19 }
   0x4   :  { %29 = vadd.xlane.f32.xlu0 %v28_v2  ;;  %v221_v8 = vld [vmem:[%s325_s3] ss:$0 sm:$0xff] }
   0x5   :  { %v116_v13 = vld [vmem:[%s326_s4] sm:$0xff] }
   0x6   :  { %v195_v14 = vld [vmem:[%s327_s5] sm:$0xff] }
   0x7   :  { %v200_v20 = vld [vmem:[%s328_s6] sm:$0xff] }
  0x8d   :  { %v30_v5 = vpop.xlane.xlu0 %29 }
  0x8e   :  { %v33_v6 = vmul.f32 %v32_v4, %v30_v5 }
  0x90   :  { %231 = vmatpush3.msra.mxu0 %v33_v6 }
  0x91   :  { %233 = vmatmul.mubr.msk.f32.vlgmr.msra.gmra.mxu0 %vm41_vm1, %v31_v7 }
 0x151   :  { %v111_v9 = vpop.f32.mrf.mxu0 }
 0x152   :  { %v112_v10 = vadd.f32 %v221_v8, %v111_v9 }
 0x153   :  { %v234_v11 = vpop.f32.mrf.mxu0 }
 0x154   :  { %v115_v12 = vmax.f32 %v112_v10, 0.0 }
 0x156   :  { %236 = vmatpush3.msk.msra.mxu1 %vm121_vm2, %v115_v12 }
 0x157   :  { %238 = vmatmul.mubr.msk.f32.vlgmr.msra.gmra.mxu1 %vm117_vm3, %v116_v13 }
 0x217   :  { %v191_v15 = vpop.f32.mrf.mxu1 }
 0x218   :  { %v196_v16 = vmul.f32 %v195_v14, %v191_v15 }
 0x219   :  { %v239_v17 = vpop.f32.mrf.mxu1 }
 0x21a   :  { %v197_v18 = vsel %vm117_vm3, %v196_v16, 0.0 }
 0x21b   :  { %198 = vadd.xlane.f32.xlu0 %v197_v18 }
 0x2a4   :  { %v199_v21 = vpop.xlane.xlu0 %198 }
 0x2a5   :  { %v201_v22 = vadd.f32 %v200_v20, %v199_v21 }
 0x2a7   :  { %v225_v23 = vmul.f32 -1.442695, %v201_v22 }
 0x2a9   :  { %245 = vpow2.f32 %v225_v23 }
 0x2b6   :  { %v246_v24 = vpop.eup %245 }
 0x2b7   :  { %v205_v25 = vadd.f32 1.0, %v246_v24 }
 0x2b9   :  { %247 = vrcp.f32 %v205_v25 }
 0x2c6   :  { %v248_v26 = vpop.eup %247 }
 0x2c7   :  { %210 = vperm.xlu1 %243, %v248_v26  }
 0x342   :  { %v211_v27 = vpop.permute.xlu1 %210 }
 0x343   :  { %v213_v28 = vmul.f32 %v211_v27, %v26_v0  ;;  %v214_v29 = vmul.f32 %v211_v27, %v27_v1 }
 0x345   :  { %215 = vst [vmem:[%s329_s7] sm:$0xff] %v213_v28  ;;  %216 = vst [vmem:[%s329_s7 + $0x8] sm:$0xff] %v214_v29 }

</bundles_post_ra>
